<compile_context>
chip_gen: v5e
topology: v5e:2x2
jax: 0.10.0
libtpu: 0.0.40
codegen_flags: <defaults>
</compile_context>

<pallas_src>
from functools import partial

import jax
import jax.numpy as jnp
from jax.experimental import pallas as pl
from jax.experimental.pallas import tpu as pltpu


def self_attention_kernel(xs_ref, ws_ref, o_ref, *, heads, batch, seq, patch_size):
    """Single-invocation kernel.

    xs_ref: (3, M, P)  stacked [q, k, v] activations, M = batch * seq
    ws_ref: (5, P, P)  stacked [Wq_bd*scale, Wk_bd, Wv_bd, Wo^T, bias-in-row-0]
    o_ref : (M, P)
    """
    f32 = jnp.float32
    P = patch_size
    D = P // heads
    M = batch * seq

    # --- fused all-head projections: one full-width MXU matmul per tensor ----------
    # (1/sqrt(P) is already folded into ws[0] by the wrapper.)
    q_proj = jnp.dot(xs_ref[0], ws_ref[0], preferred_element_type=f32)   # (M, P)
    k_proj = jnp.dot(xs_ref[1], ws_ref[1], preferred_element_type=f32)   # (M, P)
    v_proj = jnp.dot(xs_ref[2], ws_ref[2], preferred_element_type=f32)   # (M, P)

    # --- head block-diagonal selector mask, generated in-kernel (no DMA) -----------
    # hmask[h, :, c] = 1 iff column c belongs to head h  (compares only, no int div).
    h_ids = jax.lax.broadcasted_iota(jnp.int32, (heads, seq, P), 0)
    c_ids = jax.lax.broadcasted_iota(jnp.int32, (heads, seq, P), 2)
    hmask = jnp.where((c_ids >= h_ids * D) & (c_ids < h_ids * D + D),
                      1.0, 0.0).astype(f32)                              # (H, L, P)

    # --- per-batch views (sublane split; L is a multiple of 8 here) ----------------
    q3 = q_proj.reshape(batch, seq, P)
    k3 = k_proj.reshape(batch, seq, P)
    v3 = v_proj.reshape(batch, seq, P)

    # Replicate q across heads via broadcast (not concat); keep matching-head cols.
    q_bd = (q3[:, None, :, :] * hmask[None]).reshape(batch, heads * seq, P)

    # Energies for every (head, row) of each batch element in one batched MXU pass.
    energy = jnp.einsum('nrp,nkp->nrk', q_bd, k3,
                        preferred_element_type=f32)                      # (N, H*L, L)

    # --- exact softmax over the key axis (f32, exact divide) -----------------------
    energy = energy - jnp.max(energy, axis=-1, keepdims=True)
    p = jnp.exp(energy)
    attn = p / jnp.sum(p, axis=-1, keepdims=True)

    # --- attention-weighted values; keep matching-head columns, reduce head blocks -
    ctx = jnp.einsum('nrk,nkp->nrp', attn, v3,
                     preferred_element_type=f32)                         # (N, H*L, P)
    ctx = ctx * hmask.reshape(1, heads * seq, P)
    oh = jnp.sum(ctx.reshape(batch, heads, seq, P), axis=1)              # (N, L, P)

    # --- fc_out as one matmul; bias (row 0 of ws[4]) added exactly once ------------
    out = jnp.dot(oh.reshape(M, P), ws_ref[3], preferred_element_type=f32)
    out = out + ws_ref[4][0:1, :]
    o_ref[...] = out.astype(o_ref.dtype)


def self_attention(values, keys, query, wv, wk, wq, wo, bo, *, heads, patch_size):
    """Wrapper: packs activations/weights into 2 slabs (2 input DMAs) and calls kernel."""
    N, L, P = query.shape
    assert P == patch_size and P % heads == 0
    M = N * L
    scale = 1.0 / (patch_size ** 0.5)

    # Activation slab: (3, M, P) — one DMA for q, k, v.
    xs = jnp.stack([query.reshape(M, P),
                    keys.reshape(M, P),
                    values.reshape(M, P)])

    # Weight slab: (5, P, P) — block-diagonal per-head weights so x @ kron(I_H, W.T)
    # projects all heads at once; softmax scale folded into Wq; Wo^T; bias in row 0.
    eye_h = jnp.eye(heads, dtype=wq.dtype)
    wq_bd = jnp.kron(eye_h, wq.T) * jnp.asarray(scale, wq.dtype)
    wk_bd = jnp.kron(eye_h, wk.T)
    wv_bd = jnp.kron(eye_h, wv.T)
    wo_t = wo.T                                             # (P_in, P_out)
    bias_slab = jnp.zeros((P, P), dtype=wo.dtype).at[0].set(bo)
    ws = jnp.stack([wq_bd, wk_bd, wv_bd, wo_t, bias_slab])  # (5, P, P)

    # Advisory cost estimate for XLA scheduling around the custom call.
    flops = (3 * 2 * M * P * P            # q/k/v projections
             + 2 * N * heads * L * L * P  # energies
             + 2 * N * heads * L * L * P  # attn @ V
             + 2 * M * P * P)             # fc_out
    transcendentals = N * heads * L * L
    bytes_accessed = 4 * (3 * M * P + 5 * P * P + M * P)

    kernel = partial(self_attention_kernel,
                     heads=heads, batch=N, seq=L, patch_size=patch_size)
    vmem = pltpu.MemorySpace.VMEM

    out2 = pl.pallas_call(
        kernel,
        out_shape=jax.ShapeDtypeStruct((M, P), query.dtype),
        in_specs=[pl.BlockSpec(memory_space=vmem),   # xs slab
                  pl.BlockSpec(memory_space=vmem)],  # ws slab
        out_specs=pl.BlockSpec(memory_space=vmem),
        cost_estimate=pl.CostEstimate(flops=flops,
                                      transcendentals=transcendentals,
                                      bytes_accessed=bytes_accessed),
    )(xs, ws)

    return out2.reshape(N, L, P)


def ref_self_attention(values, keys, query, wv, wk, wq, wo, bo, *, heads, patch_size):
    """Pure-JAX mirror of the PyTorch forward (correctness check)."""
    N, L, P = query.shape
    D = patch_size // heads
    v = values.reshape(N, L, heads, D) @ wv.T
    k = keys.reshape(N, L, heads, D) @ wk.T
    q = query.reshape(N, L, heads, D) @ wq.T
    energy = jnp.einsum('nqhd,nkhd->nhqk', q, k)
    attn = jax.nn.softmax(energy / (patch_size ** 0.5), axis=3)
    out = jnp.einsum('nhql,nlhd->nqhd', attn, v).reshape(N, L, heads * D)
    return out @ wo.T + bo


if __name__ == "__main__":
    N = 2            # batch
    L = 8            # sequence length (value_len == key_len == query_len)
    patch_size = 32  # embed dim
    heads = 4
    head_dim = patch_size // heads  # 8

    key = jax.random.PRNGKey(0)
    kv, kk, kq, k1, k2, k3, k4, k5 = jax.random.split(key, 8)

    values = jax.random.normal(kv, (N, L, patch_size), dtype=jnp.float32)
    keys_in = jax.random.normal(kk, (N, L, patch_size), dtype=jnp.float32)
    query = jax.random.normal(kq, (N, L, patch_size), dtype=jnp.float32)

    # PyTorch nn.Linear weight layout: (out_features, in_features).
    wv = jax.random.normal(k1, (head_dim, head_dim), dtype=jnp.float32) * 0.1
    wk = jax.random.normal(k2, (head_dim, head_dim), dtype=jnp.float32) * 0.1
    wq = jax.random.normal(k3, (head_dim, head_dim), dtype=jnp.float32) * 0.1
    wo = jax.random.normal(k4, (patch_size, heads * head_dim), dtype=jnp.float32) * 0.1
    bo = jax.random.normal(k5, (patch_size,), dtype=jnp.float32) * 0.1

    out = self_attention(values, keys_in, query, wv, wk, wq, wo, bo,
                         heads=heads, patch_size=patch_size)
    out = jax.block_until_ready(out)

    ref = ref_self_attention(values, keys_in, query, wv, wk, wq, wo, bo,
                             heads=heads, patch_size=patch_size)

    err = float(jnp.max(jnp.abs(out - ref)))
    assert out.shape == (N, L, patch_size)
    assert err < 1e-3, f"max abs err = {err}"

    print("KERNEL_OK")
</pallas_src>

<mosaic_0001>
module attributes {stable_mosaic.version = 11 : i64} {
  func.func @self_attention_kernel(%arg0: memref<3x16x32xf32, #tpu.memory_space<vmem>>, %arg1: memref<5x32x32xf32, #tpu.memory_space<vmem>>, %arg2: memref<16x32xf32, #tpu.memory_space<vmem>>) attributes {dimension_semantics = [], scalar_prefetch = 0 : i64, scratch_operands = 0 : i64, tpu.core_type = #tpu.core_type<tc>} {
    %c0 = arith.constant 0 : index
    %c0_0 = arith.constant 0 : index
    %c0_1 = arith.constant 0 : index
    %0 = vector.load %arg0[%c0, %c0_0, %c0_1] : memref<3x16x32xf32, #tpu.memory_space<vmem>>, vector<1x16x32xf32>
    %1 = vector.shape_cast %0 : vector<1x16x32xf32> to vector<16x32xf32>
    %c0_2 = arith.constant 0 : index
    %c0_3 = arith.constant 0 : index
    %c0_4 = arith.constant 0 : index
    %2 = vector.load %arg1[%c0_2, %c0_3, %c0_4] : memref<5x32x32xf32, #tpu.memory_space<vmem>>, vector<1x32x32xf32>
    %3 = vector.shape_cast %2 : vector<1x32x32xf32> to vector<32x32xf32>
    %cst = arith.constant dense<0.000000e+00> : vector<16x32xf32>
    %4 = tpu.matmul %1, %3, %cst {dimension_numbers = #tpu.dot_dimension_numbers<[1], [0], [0], [1], [0, 0, 1, 1], [], []>} : vector<16x32xf32>, vector<32x32xf32>, vector<16x32xf32> -> vector<16x32xf32>
    %c1 = arith.constant 1 : index
    %c0_5 = arith.constant 0 : index
    %c0_6 = arith.constant 0 : index
    %5 = vector.load %arg0[%c1, %c0_5, %c0_6] : memref<3x16x32xf32, #tpu.memory_space<vmem>>, vector<1x16x32xf32>
    %6 = vector.shape_cast %5 : vector<1x16x32xf32> to vector<16x32xf32>
    %c1_7 = arith.constant 1 : index
    %c0_8 = arith.constant 0 : index
    %c0_9 = arith.constant 0 : index
    %7 = vector.load %arg1[%c1_7, %c0_8, %c0_9] : memref<5x32x32xf32, #tpu.memory_space<vmem>>, vector<1x32x32xf32>
    %8 = vector.shape_cast %7 : vector<1x32x32xf32> to vector<32x32xf32>
    %cst_10 = arith.constant dense<0.000000e+00> : vector<16x32xf32>
    %9 = tpu.matmul %6, %8, %cst_10 {dimension_numbers = #tpu.dot_dimension_numbers<[1], [0], [0], [1], [0, 0, 1, 1], [], []>} : vector<16x32xf32>, vector<32x32xf32>, vector<16x32xf32> -> vector<16x32xf32>
    %c2 = arith.constant 2 : index
    %c0_11 = arith.constant 0 : index
    %c0_12 = arith.constant 0 : index
    %10 = vector.load %arg0[%c2, %c0_11, %c0_12] : memref<3x16x32xf32, #tpu.memory_space<vmem>>, vector<1x16x32xf32>
    %11 = vector.shape_cast %10 : vector<1x16x32xf32> to vector<16x32xf32>
    %c2_13 = arith.constant 2 : index
    %c0_14 = arith.constant 0 : index
    %c0_15 = arith.constant 0 : index
    %12 = vector.load %arg1[%c2_13, %c0_14, %c0_15] : memref<5x32x32xf32, #tpu.memory_space<vmem>>, vector<1x32x32xf32>
    %13 = vector.shape_cast %12 : vector<1x32x32xf32> to vector<32x32xf32>
    %cst_16 = arith.constant dense<0.000000e+00> : vector<16x32xf32>
    %14 = tpu.matmul %11, %13, %cst_16 {dimension_numbers = #tpu.dot_dimension_numbers<[1], [0], [0], [1], [0, 0, 1, 1], [], []>} : vector<16x32xf32>, vector<32x32xf32>, vector<16x32xf32> -> vector<16x32xf32>
    %15 = tpu.iota {dimensions = array<i32: 0>} : vector<4x8x32xi32>
    %16 = tpu.iota {dimensions = array<i32: 2>} : vector<4x8x32xi32>
    %c8_i32 = arith.constant 8 : i32
    %17 = vector.broadcast %c8_i32 : i32 to vector<4x8x32xi32>
    %18 = arith.muli %15, %17 : vector<4x8x32xi32>
    %19 = arith.cmpi sge, %16, %18 : vector<4x8x32xi32>
    %c8_i32_17 = arith.constant 8 : i32
    %20 = vector.broadcast %c8_i32_17 : i32 to vector<4x8x32xi32>
    %21 = arith.muli %15, %20 : vector<4x8x32xi32>
    %c8_i32_18 = arith.constant 8 : i32
    %22 = vector.broadcast %c8_i32_18 : i32 to vector<4x8x32xi32>
    %23 = arith.addi %21, %22 : vector<4x8x32xi32>
    %24 = arith.cmpi slt, %16, %23 : vector<4x8x32xi32>
    %25 = arith.andi %19, %24 : vector<4x8x32xi1>
    %cst_19 = arith.constant 1.000000e+00 : f32
    %cst_20 = arith.constant 0.000000e+00 : f32
    %26 = vector.broadcast %cst_19 : f32 to vector<4x8x32xf32>
    %27 = vector.broadcast %cst_20 : f32 to vector<4x8x32xf32>
    %28 = arith.select %25, %26, %27 : vector<4x8x32xi1>, vector<4x8x32xf32>
    %29 = vector.shape_cast %4 : vector<16x32xf32> to vector<2x8x32xf32>
    %30 = vector.shape_cast %9 : vector<16x32xf32> to vector<2x8x32xf32>
    %31 = vector.shape_cast %14 : vector<16x32xf32> to vector<2x8x32xf32>
    %32 = vector.shape_cast %29 : vector<2x8x32xf32> to vector<2x1x8x32xf32>
    %33 = vector.shape_cast %28 : vector<4x8x32xf32> to vector<1x4x8x32xf32>
    %34 = vector.broadcast %32 : vector<2x1x8x32xf32> to vector<2x4x8x32xf32>
    %35 = vector.broadcast %33 : vector<1x4x8x32xf32> to vector<2x4x8x32xf32>
    %36 = arith.mulf %34, %35 : vector<2x4x8x32xf32>
    %37 = vector.shape_cast %36 : vector<2x4x8x32xf32> to vector<2x32x32xf32>
    "tpu.trace_start"() <{level = 10 : i32, message = "nrp,nkp->nrk"}> : () -> ()
    %cst_21 = arith.constant dense<0.000000e+00> : vector<2x32x8xf32>
    %38 = tpu.matmul %37, %30, %cst_21 {dimension_numbers = #tpu.dot_dimension_numbers<[2], [2], [1], [1], [0, 0, 0, 1, 1, 1], [0], [0]>} : vector<2x32x32xf32>, vector<2x8x32xf32>, vector<2x32x8xf32> -> vector<2x32x8xf32>
    "tpu.trace_stop"() : () -> ()
    %cst_22 = arith.constant dense<0xFF800000> : vector<2x32xf32>
    %39 = vector.multi_reduction <maximumf>, %38, %cst_22 [2] : vector<2x32x8xf32> to vector<2x32xf32>
    %40 = vector.shape_cast %39 : vector<2x32xf32> to vector<2x32x1xf32>
    %41 = vector.broadcast %40 : vector<2x32x1xf32> to vector<2x32x8xf32>
    %42 = arith.subf %38, %41 : vector<2x32x8xf32>
    %43 = math.exp %42 : vector<2x32x8xf32>
    %cst_23 = arith.constant dense<0.000000e+00> : vector<2x32xf32>
    %44 = vector.multi_reduction <add>, %43, %cst_23 [2] : vector<2x32x8xf32> to vector<2x32xf32>
    %45 = vector.shape_cast %44 : vector<2x32xf32> to vector<2x32x1xf32>
    %46 = vector.broadcast %45 : vector<2x32x1xf32> to vector<2x32x8xf32>
    %47 = arith.divf %43, %46 : vector<2x32x8xf32>
    "tpu.trace_start"() <{level = 10 : i32, message = "nrk,nkp->nrp"}> : () -> ()
    %cst_24 = arith.constant dense<0.000000e+00> : vector<2x32x32xf32>
    %48 = tpu.matmul %47, %31, %cst_24 {dimension_numbers = #tpu.dot_dimension_numbers<[2], [1], [1], [2], [0, 0, 0, 1, 1, 2], [0], [0]>} : vector<2x32x8xf32>, vector<2x8x32xf32>, vector<2x32x32xf32> -> vector<2x32x32xf32>
    "tpu.trace_stop"() : () -> ()
    %49 = vector.shape_cast %28 : vector<4x8x32xf32> to vector<1x32x32xf32>
    %50 = vector.broadcast %49 : vector<1x32x32xf32> to vector<2x32x32xf32>
    %51 = arith.mulf %48, %50 : vector<2x32x32xf32>
    %52 = vector.shape_cast %51 : vector<2x32x32xf32> to vector<2x4x8x32xf32>
    %cst_25 = arith.constant dense<0.000000e+00> : vector<2x8x32xf32>
    %53 = vector.multi_reduction <add>, %52, %cst_25 [1] : vector<2x4x8x32xf32> to vector<2x8x32xf32>
    %54 = vector.shape_cast %53 : vector<2x8x32xf32> to vector<16x32xf32>
    %c3 = arith.constant 3 : index
    %c0_26 = arith.constant 0 : index
    %c0_27 = arith.constant 0 : index
    %55 = vector.load %arg1[%c3, %c0_26, %c0_27] : memref<5x32x32xf32, #tpu.memory_space<vmem>>, vector<1x32x32xf32>
    %56 = vector.shape_cast %55 : vector<1x32x32xf32> to vector<32x32xf32>
    %cst_28 = arith.constant dense<0.000000e+00> : vector<16x32xf32>
    %57 = tpu.matmul %54, %56, %cst_28 {dimension_numbers = #tpu.dot_dimension_numbers<[1], [0], [0], [1], [0, 0, 1, 1], [], []>} : vector<16x32xf32>, vector<32x32xf32>, vector<16x32xf32> -> vector<16x32xf32>
    %c4 = arith.constant 4 : index
    %c0_29 = arith.constant 0 : index
    %c0_30 = arith.constant 0 : index
    %58 = vector.load %arg1[%c4, %c0_29, %c0_30] : memref<5x32x32xf32, #tpu.memory_space<vmem>>, vector<1x32x32xf32>
    %59 = vector.shape_cast %58 : vector<1x32x32xf32> to vector<32x32xf32>
    %60 = vector.extract_strided_slice %59 {offsets = [0, 0], sizes = [1, 32], strides = [1, 1]} : vector<32x32xf32> to vector<1x32xf32>
    %61 = vector.broadcast %60 : vector<1x32xf32> to vector<16x32xf32>
    %62 = arith.addf %57, %61 : vector<16x32xf32>
    %c0_31 = arith.constant 0 : index
    %c0_32 = arith.constant 0 : index
    %63 = vector.load %arg2[%c0_31, %c0_32] : memref<16x32xf32, #tpu.memory_space<vmem>>, vector<16x32xf32>
    tpu.vector_store %arg2[%c0_31, %c0_32], %62 {strides = array<i32>} : memref<16x32xf32, #tpu.memory_space<vmem>>, vector<16x32xf32>,
    return
  }
}

</mosaic_0001>

<bundles_post_ra>
// kernel: tpu_custom_call.1
= control target key start
LH: loop header
LB: loop body
LE: loop exit
PB: predicated region body
PF: predicated region fallthrough
CT: control target
= control target key end

     0   :  { %7 = vsyncpa [#allocation3], 0  ;;  %s969_s0 = inlined_call_operand.hbm [shape: f32[3,16,32], index: 0, kind: input, shape index: {}]   ;;  %s970_s1 = inlined_call_operand.hbm [shape: f32[5,32,32], index: 1, kind: input, shape index: {}]   ;;  %s971_s2 = inlined_call_operand.hbm [shape: f32[16,32], index: 2, kind: output, shape index: {}]  }
   0x1   :  { %8 = vsyncpa [#allocation6], 0 }
   0x2   :  { %9 = vsyncpa [#allocation4], 0  ;;  %s14_s11 = sshll.u32 %s969_s0, 4  ;;  %s766_s12 = smov [#allocation2]   ;;  %s15_s11 = int_to_ptr.hbm [resolvable:$true] %s14_s11 }
   0x3   :  { %s16_s13 = sshll.u32 %s766_s12, 4  ;;  %s27_s16 = sshll.u32 %s970_s1, 4  ;;  %s17_s13 = int_to_ptr.vmem [resolvable:$true] %s16_s13  ;;  %s28_s16 = int_to_ptr.hbm [resolvable:$true] %s27_s16 }
   0x4   :  { %s767_s17 = smov 128   ;;  %s768_s18 = smov 8  }
   0x5   :  { %22 = dma.hbm_to_vmem [thread:$0]  %s15_s11, 768, %s17_s13, [#allocation3], %s767_s17, %s767_s17, %s768_s18  }
   0x6   :  { %s769_s19 = smov [#allocation5]  }
   0x7   :  { %s29_s20 = sshll.u32 %s769_s19, 4  ;;  %s30_s20 = int_to_ptr.vmem [resolvable:$true] %s29_s20 }
   0x8   :  { %35 = dma.hbm_to_vmem [thread:$0]  %s28_s16, 2560, %s30_s20, [#allocation6], %s767_s17, %s767_s17, %s768_s18  }
   0x9   :  { %760 = dma.done.wait [#allocation3], 768  }
   0xa   :  { %761 = vsyncadd [#allocation3], 4294966528 }
   0xb   :  { %762 = dma.done.wait [#allocation6], 2560  }
   0xc   :  { %763 = vsyncadd [#allocation6], 4294964736  ;;  %v87_v0 = vld [vmem:[#allocation5 + $0x38] sm:$0xff]  ;;  %v86_v2 = vld [vmem:[#allocation5 + $0x30] sm:$0xff]  ;;  %vm50_vm0 = vcmask 261120   ;;  %v154_v12 = vlaneseq  ;;  %v770_v14 = vmov 0.0  }
   0xd   :  { %v49_v1 = vld [vmem:[#allocation5 + $0x18] sm:$0xff]  ;;  %106 = vmatpush.msra.mxu1 %v87_v0  ;;  %v48_v3 = vld [vmem:[#allocation5 + $0x10] sm:$0xff]  ;;  %v85_v4 = vld [vmem:[#allocation5 + $0x28] sm:$0xff]  ;;  %vm268_vm11 = vcmask 64512   ;;  %s771_s0 = smov [#allocation7]   ;;  %s610_s23 = sshll.u32 %s971_s2, 4  ;;  %s611_s23 = int_to_ptr.hbm [resolvable:$true] %s610_s23 }
   0xe   :  { %69 = vmatpush.msra.mxu0 %v49_v1  ;;  %v47_v5 = vld [vmem:[#allocation5 + $0x8] sm:$0xff]  ;;  %v84_v6 = vld [vmem:[#allocation5 + $0x20] sm:$0xff]  ;;  %v44_v9 = vld [vmem:[#allocation2] sm:$0xff]  ;;  %v155_v13 = vand.u32 127, %v154_v12  ;;  %s608_s1 = sshll.u32 %s771_s0, 4  ;;  %s609_s1 = int_to_ptr.vmem [resolvable:$true] %s608_s1 }
   0xf   :  { %107 = vmatpush.msra.mxu1 %v86_v2  ;;  %v46_v7 = vld [vmem:[#allocation5] sm:$0xff]  ;;  %v82_v10 = vld [vmem:[#allocation2 + $0x18] sm:$0xff]  ;;  %v45_v11 = vld [vmem:[#allocation2 + $0x8] sm:$0xff] }
  0x10   :  { %70 = vmatpush.msra.mxu0 %v48_v3  ;;  %v81_v8 = vld [vmem:[#allocation2 + $0x10] sm:$0xff]  ;;  %vm160_vm1 = vcmp.lt.s32.totalorder %v155_v13, 8  ;;  %vm157_vm2 = vcmp.ge.s32.totalorder %v155_v13, 8  ;;  %vm161_vm3 = vcmp.lt.s32.totalorder %v155_v13, 16  ;;  %vm158_vm5 = vcmp.ge.s32.totalorder %v155_v13, 16  ;;  %v124_v31 = vld [vmem:[#allocation5 + $0x58] sm:$0xff] }
  0x11   :  { %108 = vmatpush.msra.mxu1 %v85_v4  ;;  %v803_v15 = vsel %vm160_vm1, 1.0, %v770_v14  ;;  %vm165_vm4 = vmand %vm157_vm2, %vm161_vm3  ;;  %vm162_vm6 = vcmp.lt.s32.totalorder %v155_v13, 24  ;;  %vm159_vm8 = vcmp.ge.s32.totalorder %v155_v13, 24  ;;  %vm163_vm9 = vcmp.lt.s32.totalorder %v155_v13, 32  ;;  %143 = vmatpush.msra.mxu2 %v124_v31  ;;  %v123_v48 = vld [vmem:[#allocation5 + $0x50] sm:$0xff]  ;;  %v122_v49 = vld [vmem:[#allocation5 + $0x48] sm:$0xff] }
  0x12   :  { %71 = vmatpush.msra.mxu0 %v47_v5  ;;  %v808_v19 = vsel %vm165_vm4, 1.0, %v770_v14  ;;  %vm166_vm7 = vmand %vm158_vm5, %vm162_vm6  ;;  %v121_v50 = vld [vmem:[#allocation5 + $0x40] sm:$0xff]  ;;  %v118_v51 = vld [vmem:[#allocation2 + $0x20] sm:$0xff] }
  0x13   :  { %109 = vmatpush.msra.mxu1 %v84_v6  ;;  %v815_v24 = vsel %vm166_vm7, 1.0, %v770_v14  ;;  %vm167_vm10 = vmand %vm159_vm8, %vm163_vm9  ;;  %144 = vmatpush.msra.mxu2 %v123_v48  ;;  %v119_v52 = vld [vmem:[#allocation2 + $0x28] sm:$0xff] }
  0x14   :  { %72 = vmatpush.msra.mxu0 %v46_v7  ;;  %626 = vmatmul.msk.f32.vlgmr.msra.gmra.mxu1 %vm50_vm0, %v81_v8  ;;  %v821_v27 = vsel %vm167_vm10, 1.0, %v770_v14 }
  0x15   :  { %624 = vmatmul.msk.f32.vlgmr.msra.gmra.mxu0 %vm50_vm0, %v44_v9  ;;  %145 = vmatpush.msra.mxu2 %v122_v49 }
  0x17   :  { %146 = vmatpush.msra.mxu2 %v121_v50 }
  0x18   :  { %628 = vmatmul.msk.f32.vlgmr.msra.gmra.mxu2 %vm50_vm0, %v118_v51 }
  0x1c   :  { %627 = vmatmul.msk.f32.gmra.mxu1 %vm50_vm0, %v82_v10 }
  0x1d   :  { %625 = vmatmul.msk.f32.gmra.mxu0 %vm50_vm0, %v45_v11 }
  0x20   :  { %629 = vmatmul.msk.f32.gmra.mxu2 %vm50_vm0, %v119_v52 }
  0x91   :  { %v111_v16 = vpop.f32.mrf.mxu1 }
  0x92   :  { %v74_v17 = vpop.f32.mrf.mxu0  ;;  %630 = vmatpush.xpose.msk.msra.mxu3 %vm50_vm0, %v111_v16 }
  0x93   :  { %v172_v18 = vmul.f32 %v803_v15, %v74_v17  ;;  %v173_v23 = vmul.f32 %v808_v19, %v74_v17  ;;  %v174_v25 = vmul.f32 %v815_v24, %v74_v17  ;;  %v175_v28 = vmul.f32 %v821_v27, %v74_v17 }
  0x95   :  { %631 = vmatmul.msk.f32.vlgmr.msra.gmra.mxu3 %vm50_vm0, %v172_v18 }
  0x99   :  { %v114_v20 = vpop.f32.mrf.mxu1 }
  0x9a   :  { %v77_v21 = vpop.f32.mrf.mxu0  ;;  %635 = vmatpush.xpose.msk.msrb.mxu0 %vm50_vm0, %v114_v20 }
  0x9b   :  { %v176_v22 = vmul.f32 %v803_v15, %v77_v21  ;;  %v177_v26 = vmul.f32 %v808_v19, %v77_v21  ;;  %v178_v29 = vmul.f32 %v815_v24, %v77_v21  ;;  %v179_v30 = vmul.f32 %v821_v27, %v77_v21 }
  0x9d   :  { %632 = vmatmul.msk.f32.gmra.mxu3 %vm50_vm0, %v173_v23  ;;  %636 = vmatmul.msk.f32.vlgmr.msrb.gmra.mxu0 %vm50_vm0, %v176_v22 }
  0xa5   :  { %633 = vmatmul.msk.f32.gmra.mxu3 %vm50_vm0, %v174_v25  ;;  %637 = vmatmul.msk.f32.gmra.mxu0 %vm50_vm0, %v177_v26 }
  0xad   :  { %634 = vmatmul.msk.f32.gmra.mxu3 %vm50_vm0, %v175_v28  ;;  %638 = vmatmul.msk.f32.gmra.mxu0 %vm50_vm0, %v178_v29 }
  0xb5   :  { %639 = vmatmul.msk.f32.gmra.mxu0 %vm50_vm0, %v179_v30 }
 0x118   :  { %v212_v32 = vpop.f32.mrf.mxu3 }
 0x119   :  { %v269_v33 = vsel %vm268_vm11, %v212_v32, -inf }
 0x11a   :  { %270 = vmax.xlane.f32.xlu0 %v269_v33  ;;  %v256_v34 = vpop.f32.mrf.mxu0  ;;  %v148_v33 = vpop.f32.mrf.mxu2 }
 0x11b   :  { %v281_v35 = vsel %vm268_vm11, %v256_v34, -inf  ;;  %488 = vmatpush.msrb.mxu1 %v148_v33 }
 0x120   :  { %v215_v36 = vpop.f32.mrf.mxu3 }
 0x121   :  { %v272_v37 = vsel %vm268_vm11, %v215_v36, -inf }
 0x122   :  { %273 = vmax.xlane.f32.xlu1 %v272_v37  ;;  %282 = vmax.xlane.f32.xlu0 %v281_v35  ;;  %v259_v38 = vpop.f32.mrf.mxu0 }
 0x123   :  { %v284_v41 = vsel %vm268_vm11, %v259_v38, -inf }
 0x128   :  { %v218_v39 = vpop.f32.mrf.mxu3 }
 0x129   :  { %v275_v40 = vsel %vm268_vm11, %v218_v39, -inf }
 0x12a   :  { %276 = vmax.xlane.f32.xlu2 %v275_v40  ;;  %285 = vmax.xlane.f32.xlu1 %v284_v41  ;;  %v262_v42 = vpop.f32.mrf.mxu0 }
 0x12b   :  { %v287_v45 = vsel %vm268_vm11, %v262_v42, -inf }
 0x130   :  { %v221_v43 = vpop.f32.mrf.mxu3 }
 0x131   :  { %v278_v44 = vsel %vm268_vm11, %v221_v43, -inf }
 0x132   :  { %279 = vmax.xlane.f32.xlu0 %v278_v44  ;;  %288 = vmax.xlane.f32.xlu2 %v287_v45  ;;  %v265_v46 = vpop.f32.mrf.mxu0 }
 0x133   :  { %v290_v47 = vsel %vm268_vm11, %v265_v46, -inf }
 0x134   :  { %291 = vmax.xlane.f32.xlu1 %v290_v47 }
 0x18d   :  { %v271_v53 = vpop.xlane.xlu0 %270 }
 0x18e   :  { %v293_v54 = vsub.f32 %v212_v32, %v271_v53 }
 0x190   :  { %v301_v55 = vmul.f32 1.442695, %v293_v54 }
 0x192   :  { %656 = vpow2.f32 %v301_v55 }
 0x195   :  { %v274_v56 = vpop.xlane.xlu1 %273  ;;  %v283_v57 = vpop.xlane.xlu0 %282 }
 0x196   :  { %v294_v58 = vsub.f32 %v215_v36, %v274_v56  ;;  %v297_v59 = vsub.f32 %v256_v34, %v283_v57  ;;  %v151_v34 = vpop.f32.mrf.mxu2 }
 0x197   :  { %529 = vmatpush.msrb.mxu2 %v151_v34 }
 0x198   :  { %v839_v60 = vpop.eup %656  ;;  %v303_v61 = vmul.f32 1.442695, %v294_v58  ;;  %v309_v62 = vmul.f32 1.442695, %v297_v59 }
 0x199   :  { %v317_v63 = vsel %vm268_vm11, %v839_v60, 0.0 }
 0x19a   :  { %658 = vpow2.f32 %v303_v61  ;;  %318 = vadd.xlane.f32.xlu2 %v317_v63 }
 0x19b   :  { %660 = vpow2.f32 %v309_v62 }
 0x19d   :  { %v277_v0 = vpop.xlane.xlu2 %276  ;;  %v286_v1 = vpop.xlane.xlu1 %285 }
 0x19e   :  { %v295_v2 = vsub.f32 %v218_v39, %v277_v0  ;;  %v298_v3 = vsub.f32 %v259_v38, %v286_v1 }
 0x1a0   :  { %v843_v4 = vpop.eup %658  ;;  %v305_v5 = vmul.f32 1.442695, %v295_v2  ;;  %v311_v6 = vmul.f32 1.442695, %v298_v3 }
 0x1a1   :  { %v845_v7 = vpop.eup %660  ;;  %v320_v8 = vsel %vm268_vm11, %v843_v4, 0.0 }
 0x1a2   :  { %662 = vpow2.f32 %v305_v5  ;;  %v329_v9 = vsel %vm268_vm11, %v845_v7, 0.0  ;;  %321 = vadd.xlane.f32.xlu1 %v320_v8 }
 0x1a3   :  { %664 = vpow2.f32 %v311_v6  ;;  %330 = vadd.xlane.f32.xlu0 %v329_v9 }
 0x1a5   :  { %v280_v10 = vpop.xlane.xlu0 %279  ;;  %v289_v11 = vpop.xlane.xlu2 %288 }
 0x1a6   :  { %v296_v12 = vsub.f32 %v221_v43, %v280_v10  ;;  %v299_v13 = vsub.f32 %v262_v42, %v289_v11 }
 0x1a7   :  { %v292_v14 = vpop.xlane.xlu1 %291 }
 0x1a8   :  { %v851_v16 = vpop.eup %662  ;;  %v307_v17 = vmul.f32 1.442695, %v296_v12  ;;  %v313_v18 = vmul.f32 1.442695, %v299_v13  ;;  %v300_v20 = vsub.f32 %v265_v46, %v292_v14 }
 0x1a9   :  { %v853_v21 = vpop.eup %664  ;;  %v323_v22 = vsel %vm268_vm11, %v851_v16, 0.0 }
 0x1aa   :  { %666 = vpow2.f32 %v307_v17  ;;  %v315_v23 = vmul.f32 1.442695, %v300_v20  ;;  %v332_v25 = vsel %vm268_vm11, %v853_v21, 0.0 }
 0x1ab   :  { %668 = vpow2.f32 %v313_v18  ;;  %324 = vadd.xlane.f32.xlu0 %v323_v22  ;;  %333 = vadd.xlane.f32.xlu2 %v332_v25 }
 0x1ac   :  { %670 = vpow2.f32 %v315_v23 }
 0x1b0   :  { %v859_v26 = vpop.eup %666 }
 0x1b1   :  { %v861_v28 = vpop.eup %668  ;;  %v326_v29 = vsel %vm268_vm11, %v859_v26, 0.0 }
 0x1b2   :  { %v865_v30 = vpop.eup %670  ;;  %v335_v31 = vsel %vm268_vm11, %v861_v28, 0.0 }
 0x1b3   :  { %327 = vadd.xlane.f32.xlu2 %v326_v29  ;;  %336 = vadd.xlane.f32.xlu1 %v335_v31  ;;  %v338_v32 = vsel %vm268_vm11, %v865_v30, 0.0 }
 0x1b4   :  { %339 = vadd.xlane.f32.xlu0 %v338_v32 }
 0x20d   :  { %v319_v35 = vpop.xlane.xlu2 %318 }
 0x20e   :  { %672 = vrcp.f32 %v319_v35  ;;  %v352_v41 = vand.u32 2147483648, %v319_v35  ;;  %v350_v43 = vand.u32 2147483647, %v319_v35  ;;  %vm346_vm13 = vweird.f32 %v319_v35 }
 0x210   :  { %v353_v46 = vor.u32 1.1754944e-38, %v352_v41  ;;  %vm351_vm15 = vcmp.eq.f32.partialorder %v350_v43, 8.507059e+37 }
 0x214   :  { %v673_v36 = vpop.eup %672 }
 0x215   :  { %v342_v37 = vmul.f32 %v673_v36, %v319_v35  ;;  %v322_v38 = vpop.xlane.xlu1 %321  ;;  %vm347_vm12 = vweird.f32 %v673_v36 }
 0x216   :  { %v871_v39 = vpop.xlane.xlu0 %330  ;;  %674 = vrcp.f32 %v322_v38  ;;  %vm348_vm14 = vmor %vm346_vm13, %vm347_vm12  ;;  %v367_v59 = vand.u32 2147483648, %v322_v38  ;;  %v365_v62 = vand.u32 2147483647, %v322_v38  ;;  %vm361_vm2 = vweird.f32 %v322_v38 }
 0x217   :  { %v343_v40 = vsub.f32 1.0, %v342_v37  ;;  %676 = vrcp.f32 %v871_v39  ;;  %v412_v63 = vand.u32 2147483648, %v871_v39  ;;  %vm406_vm5 = vweird.f32 %v871_v39 }
 0x218   :  { %v368_v10 = vor.u32 1.1754944e-38, %v367_v59  ;;  %vm366_vm6 = vcmp.eq.f32.partialorder %v365_v62, 8.507059e+37 }
 0x219   :  { %v344_v42 = vmul.f32 %v673_v36, %v343_v40  ;;  %v413_v14 = vor.u32 1.1754944e-38, %v412_v63 }
 0x21b   :  { %v345_v44 = vadd.f32 %v673_v36, %v344_v42 }
 0x21c   :  { %v675_v45 = vpop.eup %674 }
 0x21d   :  { %v677_v47 = vpop.eup %676  ;;  %v357_v48 = vmul.f32 %v675_v45, %v322_v38  ;;  %v349_v49 = vsel %vm348_vm14, %v673_v36, %v345_v44  ;;  %vm362_vm1 = vweird.f32 %v675_v45 }
 0x21e   :  { %v402_v50 = vmul.f32 %v677_v47, %v871_v39  ;;  %v875_v51 = vpop.xlane.xlu0 %324  ;;  %v877_v52 = vpop.xlane.xlu2 %333  ;;  %v354_v53 = vsel %vm351_vm15, %v353_v46, %v349_v49  ;;  %vm407_vm3 = vweird.f32 %v677_v47  ;;  %vm884_vm4 = vmor %vm361_vm2, %vm362_vm1 }
 0x21f   :  { %v358_v54 = vsub.f32 1.0, %v357_v48  ;;  %678 = vrcp.f32 %v875_v51  ;;  %v355_v57 = vmul.f32 %v839_v60, %v354_v53  ;;  %v410_v60 = vand.u32 2147483647, %v871_v39  ;;  %vm901_vm7 = vmor %vm406_vm5, %vm407_vm3 }
 0x220   :  { %v403_v55 = vsub.f32 1.0, %v402_v50  ;;  %680 = vrcp.f32 %v877_v52  ;;  %v382_v18 = vand.u32 2147483648, %v875_v51  ;;  %v427_v22 = vand.u32 2147483648, %v877_v52 }
 0x221   :  { %v359_v56 = vmul.f32 %v675_v45, %v358_v54  ;;  %640 = vmatmul.msk.f32.vlgmr.msrb.gmra.mxu1 %vm268_vm11, %v355_v57  ;;  %v380_v31 = vand.u32 2147483647, %v875_v51  ;;  %vm411_vm9 = vcmp.eq.f32.partialorder %v410_v60, 8.507059e+37  ;;  %vm376_vm10 = vweird.f32 %v875_v51 }
 0x222   :  { %v404_v58 = vmul.f32 %v677_v47, %v403_v55  ;;  %v425_v33 = vand.u32 2147483647, %v877_v52  ;;  %vm421_vm12 = vweird.f32 %v877_v52  ;;  %v383_v38 = vor.u32 1.1754944e-38, %v382_v18  ;;  %v566_v18 = vld [vmem:[#allocation5 + $0x60] sm:$0xff] }
 0x223   :  { %v360_v61 = vadd.f32 %v675_v45, %v359_v56  ;;  %v428_v42 = vor.u32 1.1754944e-38, %v427_v22  ;;  %vm381_vm15 = vcmp.eq.f32.partialorder %v380_v31, 8.507059e+37 }
 0x224   :  { %v405_v1 = vadd.f32 %v677_v47, %v404_v58  ;;  %vm426_vm2 = vcmp.eq.f32.partialorder %v425_v33, 8.507059e+37 }
 0x225   :  { %v679_v0 = vpop.eup %678  ;;  %v364_v9 = vsel %vm884_vm4, %v675_v45, %v360_v61 }
 0x226   :  { %v681_v3 = vpop.eup %680  ;;  %v372_v5 = vmul.f32 %v679_v0, %v875_v51  ;;  %v891_v6 = vpop.xlane.xlu2 %327  ;;  %v369_v23 = vsel %vm366_vm6, %v368_v10, %v364_v9  ;;  %v409_v25 = vsel %vm901_vm7, %v677_v47, %v405_v1  ;;  %vm377_vm8 = vweird.f32 %v679_v0 }
 0x227   :  { %v893_v8 = vpop.xlane.xlu1 %336  ;;  %v417_v11 = vmul.f32 %v681_v3, %v877_v52  ;;  %682 = vrcp.f32 %v891_v6  ;;  %v899_v12 = vpop.xlane.xlu0 %339  ;;  %v370_v34 = vmul.f32 %v843_v4, %v369_v23  ;;  %v414_v35 = vsel %vm411_vm9, %v413_v14, %v409_v25  ;;  %vm378_vm13 = vmor %vm376_vm10, %vm377_vm8  ;;  %v568_v14 = vld [vmem:[#allocation5 + $0x70] sm:$0xff] }
 0x228   :  { %v373_v17 = vsub.f32 1.0, %v372_v5  ;;  %684 = vrcp.f32 %v893_v8  ;;  %v415_v39 = vmul.f32 %v845_v7, %v414_v35  ;;  %vm422_vm14 = vweird.f32 %v681_v3 }
 0x229   :  { %v418_v20 = vsub.f32 1.0, %v417_v11  ;;  %686 = vrcp.f32 %v899_v12  ;;  %641 = vmatmul.msk.f32.gmra.mxu1 %vm268_vm11, %v370_v34  ;;  %vm423_vm1 = vmor %vm421_vm12, %vm422_vm14  ;;  %v395_v48 = vand.u32 2147483647, %v891_v6  ;;  %v397_v50 = vand.u32 2147483648, %v891_v6 }
 0x22a   :  { %v374_v29 = vmul.f32 %v679_v0, %v373_v17  ;;  %644 = vmatmul.msk.f32.vlgmr.msrb.gmra.mxu2 %vm268_vm11, %v415_v39  ;;  %v440_v53 = vand.u32 2147483647, %v893_v8  ;;  %v442_v55 = vand.u32 2147483648, %v893_v8  ;;  %vm391_vm5 = vweird.f32 %v891_v6  ;;  %v567_v17 = vld [vmem:[#allocation5 + $0x68] sm:$0xff] }
 0x22b   :  { %v419_v32 = vmul.f32 %v681_v3, %v418_v20  ;;  %v398_v62 = vor.u32 1.1754944e-38, %v397_v50  ;;  %vm436_vm7 = vweird.f32 %v893_v8  ;;  %vm396_vm8 = vcmp.eq.f32.partialorder %v395_v48, 8.507059e+37 }
 0x22c   :  { %v375_v36 = vadd.f32 %v679_v0, %v374_v29  ;;  %vm441_vm10 = vcmp.eq.f32.partialorder %v440_v53, 8.507059e+37  ;;  %v455_v9 = vand.u32 2147483647, %v899_v12 }
 0x22d   :  { %v683_v37 = vpop.eup %682  ;;  %v420_v40 = vadd.f32 %v681_v3, %v419_v32 }
 0x22e   :  { %v685_v41 = vpop.eup %684  ;;  %v387_v43 = vmul.f32 %v683_v37, %v891_v6  ;;  %v379_v44 = vsel %vm378_vm13, %v679_v0, %v375_v36  ;;  %vm392_vm3 = vweird.f32 %v683_v37  ;;  %v443_v0 = vor.u32 1.1754944e-38, %v442_v55 }
 0x22f   :  { %v432_v4 = vmul.f32 %v685_v41, %v893_v8  ;;  %v384_v45 = vsel %vm381_vm15, %v383_v38, %v379_v44  ;;  %v424_v7 = vsel %vm423_vm1, %v681_v3, %v420_v40  ;;  %v687_v46 = vpop.eup %686  ;;  %vm437_vm4 = vweird.f32 %v685_v41  ;;  %vm393_vm6 = vmor %vm391_vm5, %vm392_vm3 }
 0x230   :  { %v388_v47 = vsub.f32 1.0, %v387_v43  ;;  %v429_v49 = vsel %vm426_vm2, %v428_v42, %v424_v7  ;;  %v447_v52 = vmul.f32 %v687_v46, %v899_v12  ;;  %v385_v56 = vmul.f32 %v851_v16, %v384_v45  ;;  %vm438_vm9 = vmor %vm436_vm7, %vm437_vm4 }
 0x231   :  { %v433_v51 = vsub.f32 1.0, %v432_v4  ;;  %v430_v59 = vmul.f32 %v853_v21, %v429_v49  ;;  %vm452_vm12 = vweird.f32 %v687_v46  ;;  %v457_v8 = vand.u32 2147483648, %v899_v12 }
 0x232   :  { %v389_v54 = vmul.f32 %v683_v37, %v388_v47  ;;  %v448_v58 = vsub.f32 1.0, %v447_v52  ;;  %642 = vmatmul.msk.f32.gmra.mxu1 %vm268_vm11, %v385_v56  ;;  %vm451_vm13 = vweird.f32 %v899_v12  ;;  %vm456_vm15 = vcmp.eq.f32.partialorder %v455_v9, 8.507059e+37 }
 0x233   :  { %v434_v57 = vmul.f32 %v685_v41, %v433_v51  ;;  %645 = vmatmul.msk.f32.gmra.mxu2 %vm268_vm11, %v430_v59  ;;  %vm453_vm14 = vmor %vm451_vm13, %vm452_vm12  ;;  %v458_v11 = vor.u32 1.1754944e-38, %v457_v8 }
 0x234   :  { %v390_v61 = vadd.f32 %v683_v37, %v389_v54  ;;  %v449_v16 = vmul.f32 %v687_v46, %v448_v58 }
 0x235   :  { %v435_v63 = vadd.f32 %v685_v41, %v434_v57 }
 0x236   :  { %v394_v1 = vsel %vm393_vm6, %v683_v37, %v390_v61  ;;  %v450_v5 = vadd.f32 %v687_v46, %v449_v16 }
 0x237   :  { %v399_v2 = vsel %vm396_vm8, %v398_v62, %v394_v1  ;;  %v439_v21 = vsel %vm438_vm9, %v685_v41, %v435_v63 }
 0x238   :  { %v444_v3 = vsel %vm441_vm10, %v443_v0, %v439_v21  ;;  %v400_v60 = vmul.f32 %v859_v26, %v399_v2  ;;  %v454_v10 = vsel %vm453_vm14, %v687_v46, %v450_v5 }
 0x239   :  { %v445_v6 = vmul.f32 %v861_v28, %v444_v3  ;;  %v459_v13 = vsel %vm456_vm15, %v458_v11, %v454_v10  ;;  %v569_v28 = vld [vmem:[#allocation5 + $0x78] sm:$0xff] }
 0x23a   :  { %643 = vmatmul.msk.f32.gmra.mxu1 %vm268_vm11, %v400_v60  ;;  %v460_v26 = vmul.f32 %v865_v30, %v459_v13  ;;  %591 = vmatpush.msrb.mxu3 %v569_v28 }
 0x23b   :  { %646 = vmatmul.msk.f32.gmra.mxu2 %vm268_vm11, %v445_v6 }
 0x23c   :  { %592 = vmatpush.msrb.mxu3 %v568_v14 }
 0x23e   :  { %593 = vmatpush.msrb.mxu3 %v567_v17 }
 0x240   :  { %594 = vmatpush.msrb.mxu3 %v566_v18 }
 0x243   :  { %647 = vmatmul.msk.f32.gmra.mxu2 %vm268_vm11, %v460_v26 }
 0x29e   :  { %v490_v12 = vpop.f32.mrf.mxu1 }
 0x29f   :  { %v543_v29 = vmul.f32 %v490_v12, %v803_v15 }
 0x2a1   :  { %v551_v32 = vsel %vm50_vm0, %v543_v29, 0.0 }
 0x2a6   :  { %v493_v20 = vpop.f32.mrf.mxu1 }
 0x2a7   :  { %v544_v25 = vmul.f32 %v493_v20, %v808_v19 }
 0x2a9   :  { %v552_v31 = vsel %vm50_vm0, %v544_v25, 0.0 }
 0x2aa   :  { %v553_v35 = vadd.f32 %v552_v31, %v551_v32 }
 0x2ad   :  { %v531_v22 = vpop.f32.mrf.mxu2 }
 0x2ae   :  { %v547_v43 = vmul.f32 %v531_v22, %v803_v15 }
 0x2af   :  { %v496_v23 = vpop.f32.mrf.mxu1 }
 0x2b0   :  { %v545_v30 = vmul.f32 %v496_v23, %v815_v24  ;;  %v558_v45 = vsel %vm50_vm0, %v547_v43, 0.0 }
 0x2b2   :  { %v554_v33 = vsel %vm50_vm0, %v545_v30, 0.0 }
 0x2b3   :  { %v555_v38 = vadd.f32 %v554_v33, %v553_v35 }
 0x2b6   :  { %v534_v34 = vpop.f32.mrf.mxu2 }
 0x2b7   :  { %v499_v36 = vpop.f32.mrf.mxu1  ;;  %v548_v42 = vmul.f32 %v534_v34, %v808_v19  ;;  %v571_v19 = vld [vmem:[#allocation5 + $0x80] sm:$0xff] }
 0x2b8   :  { %v546_v37 = vmul.f32 %v499_v36, %v821_v27  ;;  %v572_v15 = vperm.slane %v571_v19, 0 }
 0x2b9   :  { %v559_v4 = vsel %vm50_vm0, %v548_v42, 0.0 }
 0x2ba   :  { %v556_v39 = vsel %vm50_vm0, %v546_v37, 0.0  ;;  %v560_v46 = vadd.f32 %v559_v4, %v558_v45 }
 0x2bb   :  { %v557_v40 = vadd.f32 %v556_v39, %v555_v38 }
 0x2bd   :  { %648 = vmatmul.msk.f32.vlgmr.msrb.gmra.mxu3 %vm50_vm0, %v557_v40 }
 0x2be   :  { %v537_v41 = vpop.f32.mrf.mxu2 }
 0x2bf   :  { %v549_v44 = vmul.f32 %v537_v41, %v815_v24 }
 0x2c1   :  { %v561_v7 = vsel %vm50_vm0, %v549_v44, 0.0 }
 0x2c2   :  { %v562_v49 = vadd.f32 %v561_v7, %v560_v46 }
 0x2c6   :  { %v540_v47 = vpop.f32.mrf.mxu2 }
 0x2c7   :  { %v550_v48 = vmul.f32 %v540_v47, %v821_v27 }
 0x2c9   :  { %v563_v50 = vsel %vm50_vm0, %v550_v48, 0.0 }
 0x2ca   :  { %v564_v51 = vadd.f32 %v563_v50, %v562_v49 }
 0x2cc   :  { %649 = vmatmul.msk.f32.gmra.mxu3 %vm50_vm0, %v564_v51 }
 0x340   :  { %v596_v53 = vpop.f32.mrf.mxu3 }
 0x341   :  { %v597_v24 = vadd.f32 %v596_v53, %v572_v15 }
 0x343   :  { %602 = vst.msk [vmem:[#allocation7] sm:$0xff] %vm50_vm0, %v597_v24 }
 0x34f   :  { %v599_v52 = vpop.f32.mrf.mxu3 }
 0x350   :  { %v600_v27 = vadd.f32 %v599_v52, %v572_v15 }
 0x352   :  { %603 = vst.msk [vmem:[#allocation7 + $0x8] sm:$0xff] %vm50_vm0, %v600_v27 }
 0x353   :  { %616 = dma.vmem_to_hbm [thread:$0]  %s609_s1, 256, %s611_s23, [#allocation4], %s767_s17, %s767_s17, %s768_s18  }
 0x354   :  { %764 = dma.done.wait [#allocation4], 256  }
 0x355   :  { %765 = vsyncadd [#allocation4], 4294967040 }
 0x356   :  { %621 = vsyncpa [#allocation3], 1 }
 0x357   :  { %622 = vsyncpa [#allocation6], 1 }
 0x358   :  { %623 = vsyncpa [#allocation4], 1 }

</bundles_post_ra>
